<compile_context>
chip_gen: v7x
topology: tpu7x:2x2x1
jax: 0.10.0
libtpu: 0.0.40
codegen_flags: <defaults>
</compile_context>

<pallas_src>
import functools

import jax
import jax.numpy as jnp
from jax import lax
from jax.experimental import pallas as pl
from jax.experimental.pallas import tpu as pltpu

# bf16 MXU inputs with f32 accumulation (review recommendation for v5e/v6e/v7x).
# Set to jnp.float32 to track the PyTorch f32 conv more tightly.
MATMUL_DTYPE = jnp.bfloat16


def _resblock_kernel(x_ref, wband_ref, gsum_ref, gamma_ref, beta_ref,
                     out_ref, lhs_ref, *, inv_count):
    """Fused conv3x3 + BatchNorm(batch stats) + ReLU + residual.

    x_ref    : (N, H, W*C)   f32 lane-dense input rows (lane = w*C + c)
    wband_ref: (3*W*C, W*C)  banded weights, kh taps concatenated along K
    gsum_ref : (W*C, W*C)    0/1 matrix, gsum[i,j] = (i % C == j % C)
    gamma_ref: (1, W*C)      BN gamma in lane layout
    beta_ref : (1, W*C)      BN beta in lane layout
    out_ref  : (N, H, W*C)   f32 output
    lhs_ref  : (N, H, 3*W*C) f32 VMEM scratch holding the conv LHS
    """
    N, H, WC = x_ref.shape
    xa = x_ref[...]                                    # read x exactly once (f32)

    # ---- build the K-concatenated conv LHS in VMEM (H padding = zero rows) --
    # lhs[:, h, kh*WC:(kh+1)*WC] = x[:, h + kh - 1, :]   (zero outside 0..H-1)
    lhs_ref[...] = jnp.zeros_like(lhs_ref)
    lhs_ref[:, pl.ds(1, H - 1), pl.ds(0, WC)] = xa[:, : H - 1, :]     # kh = 0
    lhs_ref[:, pl.ds(0, H), pl.ds(WC, WC)] = xa                       # kh = 1
    lhs_ref[:, pl.ds(0, H - 1), pl.ds(2 * WC, WC)] = xa[:, 1:, :]     # kh = 2

    # ---- 3x3 conv == ONE matmul (kw taps + W padding folded into wband) -----
    lhs = lhs_ref[...].reshape(N * H, 3 * WC).astype(wband_ref.dtype)
    conv = jnp.dot(lhs, wband_ref[...], preferred_element_type=jnp.float32)

    # ---- BatchNorm batch statistics (f32, one-pass sum / sum-of-squares) ----
    s = jnp.sum(conv, axis=0, keepdims=True)           # (1, WC) per-lane sums
    ss = jnp.sum(conv * conv, axis=0, keepdims=True)   # (1, WC)
    # Sum the W lane-groups of each channel AND broadcast the channel stats
    # back to the lane layout in one tiny matmul (no cross-lane reshape).
    s_b = jnp.dot(s, gsum_ref[...], preferred_element_type=jnp.float32)
    ss_b = jnp.dot(ss, gsum_ref[...], preferred_element_type=jnp.float32)
    mean = s_b * inv_count
    var = ss_b * inv_count - mean * mean               # biased var (training mode)
    inv_std = lax.rsqrt(var + 1e-5)
    scale = gamma_ref[...] * inv_std                   # (1, WC)
    bias = beta_ref[...] - mean * scale                # (1, WC)

    # ---- normalize + ReLU + residual add ------------------------------------
    y = jnp.maximum(conv * scale + bias, 0.0) + xa.reshape(N * H, WC)
    out_ref[...] = y.reshape(N, H, WC)


def _banded_weights(weight_oihw, W):
    """Fold the 3 kw taps (and the W-direction zero padding) of a 3x3 conv into
    three (W*C, W*C) banded matrices and concatenate them along K -> (3*W*C, W*C)."""
    C = weight_oihw.shape[1]
    w = jnp.transpose(weight_oihw, (2, 3, 1, 0)).astype(jnp.float32)  # (kh,kw,Cin,Cout)
    bands = []
    for kh in range(3):
        band = jnp.zeros((W * C, W * C), jnp.float32)
        for kw in range(3):
            # input column w_in = w_out + kw - 1; out-of-range columns have no
            # entry in the band => implements the zero padding along W.
            shift = jnp.eye(W, k=1 - kw, dtype=jnp.float32)
            band = band + jnp.kron(shift, w[kh, kw])
        bands.append(band)
    return jnp.concatenate(bands, axis=0)  # (3*W*C, W*C)


@jax.jit
def resblock_pallas(x_nchw, weight_oihw, gamma, beta):
    """PyTorch ResBlock.forward (training-mode BN) on TPU via one Pallas kernel.

    x_nchw: (N, C, H, W) f32; weight_oihw: (C, C, 3, 3) f32; gamma/beta: (C,).
    Returns (N, C, H, W) f32.
    """
    N, C, H, W = x_nchw.shape
    WC = W * C

    # NCHW -> lane-dense (N, H, W*C): lane index = w*C + c.
    x_rows = jnp.transpose(x_nchw, (0, 2, 3, 1)).reshape(N, H, WC)

    wband = _banded_weights(weight_oihw, W).astype(MATMUL_DTYPE)      # (3*WC, WC)

    # 0/1 group-sum matrix: sums the W copies of each channel, broadcasts back.
    lane_c = jnp.arange(WC, dtype=jnp.int32) % C
    gsum = (lane_c[:, None] == lane_c[None, :]).astype(jnp.float32)   # (WC, WC)

    gamma_l = jnp.tile(gamma.astype(jnp.float32), W).reshape(1, WC)
    beta_l = jnp.tile(beta.astype(jnp.float32), W).reshape(1, WC)

    kernel = functools.partial(_resblock_kernel,
                               inv_count=1.0 / float(N * H * W))

    out_rows = pl.pallas_call(
        kernel,
        # Whole batch in a single grid step (B = N): grows the matmul M to N*H,
        # amortizes step overhead, and lets the BN stats live entirely in VMEM.
        grid=(1,),
        in_specs=[
            pl.BlockSpec((N, H, WC), lambda i: (0, 0, 0)),        # x (read once)
            pl.BlockSpec((3 * WC, WC), lambda i: (0, 0)),         # banded weights
            pl.BlockSpec((WC, WC), lambda i: (0, 0)),             # group-sum matrix
            pl.BlockSpec((1, WC), lambda i: (0, 0)),              # gamma (lanes)
            pl.BlockSpec((1, WC), lambda i: (0, 0)),              # beta  (lanes)
        ],
        out_specs=pl.BlockSpec((N, H, WC), lambda i: (0, 0, 0)),
        out_shape=jax.ShapeDtypeStruct((N, H, WC), jnp.float32),
        scratch_shapes=[pltpu.VMEM((N, H, 3 * WC), jnp.float32)],  # conv LHS
        compiler_params=pltpu.CompilerParams(
            dimension_semantics=("arbitrary",)),
    )(x_rows, wband, gsum, gamma_l, beta_l)

    # lane-dense rows -> NHWC -> NCHW (PyTorch output convention).
    return jnp.transpose(out_rows.reshape(N, H, W, C), (0, 3, 1, 2))


def resblock_reference(x_nchw, weight_oihw, gamma, beta):
    """Pure-JAX reference matching PyTorch ResBlock.forward (training mode)."""
    conv = lax.conv_general_dilated(
        x_nchw, weight_oihw, window_strides=(1, 1), padding=((1, 1), (1, 1)),
        dimension_numbers=("NCHW", "OIHW", "NCHW"))
    mean = jnp.mean(conv, axis=(0, 2, 3), keepdims=True)
    var = jnp.mean((conv - mean) ** 2, axis=(0, 2, 3), keepdims=True)
    y = (conv - mean) * lax.rsqrt(var + 1e-5)
    y = y * gamma.reshape(1, -1, 1, 1) + beta.reshape(1, -1, 1, 1)
    y = jnp.maximum(y, 0.0)
    return y + x_nchw


# TODO(synk): BatchNorm running_mean/running_var EMA buffer updates (training
# bookkeeping) are not emitted; the forward output does not depend on them.

if __name__ == "__main__":
    N, C, H, W = 2, 8, 16, 16     # W*C = 128 -> fully lane-dense internal layout

    key = jax.random.PRNGKey(0)
    kx, kw = jax.random.split(key)

    x = jax.random.normal(kx, (N, C, H, W), dtype=jnp.float32)

    # kaiming_normal_(nonlinearity='relu'): std = sqrt(2 / fan_in), fan_in = C*9
    fan_in = C * 3 * 3
    weight = jax.random.normal(kw, (C, C, 3, 3), dtype=jnp.float32) * jnp.sqrt(
        2.0 / fan_in)
    gamma = jnp.full((C,), 0.5, dtype=jnp.float32)   # constant_(bn.weight, 0.5)
    beta = jnp.zeros((C,), dtype=jnp.float32)        # zeros_(bn.bias)

    out = jax.block_until_ready(resblock_pallas(x, weight, gamma, beta))
    ref = jax.block_until_ready(resblock_reference(x, weight, gamma, beta))

    assert out.shape == (N, C, H, W) and out.dtype == jnp.float32
    max_err = float(jnp.max(jnp.abs(out - ref)))
    # bf16 MXU inputs (f32 accumulation) vs the f32 PyTorch-style reference:
    # tolerance widened per review; measured error is ~1e-2 worst case.
    assert jnp.allclose(out, ref, atol=5e-2, rtol=5e-2), max_err
    print("KERNEL_OK")
</pallas_src>

<mosaic_0001>
module attributes {stable_mosaic.version = 11 : i64} {
  func.func @_resblock_kernel(%arg0: i32, %arg1: memref<2x16x128xf32, #tpu.memory_space<vmem>>, %arg2: memref<384x128xbf16, #tpu.memory_space<vmem>>, %arg3: memref<128x128xf32, #tpu.memory_space<vmem>>, %arg4: memref<1x128xf32, #tpu.memory_space<vmem>>, %arg5: memref<1x128xf32, #tpu.memory_space<vmem>>, %arg6: memref<2x16x128xf32, #tpu.memory_space<vmem>>, %arg7: memref<2x16x384xf32, #tpu.memory_space<vmem>>) attributes {dimension_semantics = [#tpu.dimension_semantics<arbitrary>], iteration_bounds = array<i64: 1>, scalar_prefetch = 0 : i64, scratch_operands = 1 : i64, tpu.core_type = #tpu.core_type<tc>, window_params = [{pipeline_mode = #tpu.pipeline_mode<synchronous>, transform_indices = @transform_0, window_bounds = array<i64: 2, 16, 128>}, {pipeline_mode = #tpu.pipeline_mode<synchronous>, transform_indices = @transform_1, window_bounds = array<i64: 384, 128>}, {pipeline_mode = #tpu.pipeline_mode<synchronous>, transform_indices = @transform_2, window_bounds = array<i64: 128, 128>}, {pipeline_mode = #tpu.pipeline_mode<synchronous>, transform_indices = @transform_3, window_bounds = array<i64: 1, 128>}, {pipeline_mode = #tpu.pipeline_mode<synchronous>, transform_indices = @transform_4, window_bounds = array<i64: 1, 128>}, {pipeline_mode = #tpu.pipeline_mode<synchronous>, transform_indices = @transform_5, window_bounds = array<i64: 2, 16, 128>}]} {
    %c0 = arith.constant 0 : index
    %c0_0 = arith.constant 0 : index
    %c0_1 = arith.constant 0 : index
    %0 = vector.load %arg1[%c0, %c0_0, %c0_1] : memref<2x16x128xf32, #tpu.memory_space<vmem>>, vector<2x16x128xf32>
    %cst = arith.constant 0.000000e+00 : f32
    %1 = vector.broadcast %cst : f32 to vector<2x16x384xf32>
    %c0_2 = arith.constant 0 : index
    %c0_3 = arith.constant 0 : index
    %c0_4 = arith.constant 0 : index
    %2 = vector.load %arg7[%c0_2, %c0_3, %c0_4] : memref<2x16x384xf32, #tpu.memory_space<vmem>>, vector<2x16x384xf32>
    tpu.vector_store %arg7[%c0_2, %c0_3, %c0_4], %1 {strides = array<i32>} : memref<2x16x384xf32, #tpu.memory_space<vmem>>, vector<2x16x384xf32>,
    %3 = vector.extract_strided_slice %0 {offsets = [0, 0, 0], sizes = [2, 15, 128], strides = [1, 1, 1]} : vector<2x16x128xf32> to vector<2x15x128xf32>
    %c0_5 = arith.constant 0 : index
    %c1 = arith.constant 1 : index
    %c0_6 = arith.constant 0 : index
    %4 = vector.load %arg7[%c0_5, %c1, %c0_6] : memref<2x16x384xf32, #tpu.memory_space<vmem>>, vector<2x15x128xf32>
    tpu.vector_store %arg7[%c0_5, %c1, %c0_6], %3 {strides = array<i32>} : memref<2x16x384xf32, #tpu.memory_space<vmem>>, vector<2x15x128xf32>,
    %c0_7 = arith.constant 0 : index
    %c0_8 = arith.constant 0 : index
    %c128 = arith.constant 128 : index
    %5 = vector.load %arg7[%c0_7, %c0_8, %c128] : memref<2x16x384xf32, #tpu.memory_space<vmem>>, vector<2x16x128xf32>
    tpu.vector_store %arg7[%c0_7, %c0_8, %c128], %0 {strides = array<i32>} : memref<2x16x384xf32, #tpu.memory_space<vmem>>, vector<2x16x128xf32>,
    %6 = vector.extract_strided_slice %0 {offsets = [0, 1, 0], sizes = [2, 15, 128], strides = [1, 1, 1]} : vector<2x16x128xf32> to vector<2x15x128xf32>
    %c0_9 = arith.constant 0 : index
    %c0_10 = arith.constant 0 : index
    %c256 = arith.constant 256 : index
    %7 = vector.load %arg7[%c0_9, %c0_10, %c256] : memref<2x16x384xf32, #tpu.memory_space<vmem>>, vector<2x15x128xf32>
    tpu.vector_store %arg7[%c0_9, %c0_10, %c256], %6 {strides = array<i32>} : memref<2x16x384xf32, #tpu.memory_space<vmem>>, vector<2x15x128xf32>,
    %c0_11 = arith.constant 0 : index
    %c0_12 = arith.constant 0 : index
    %c0_13 = arith.constant 0 : index
    %8 = vector.load %arg7[%c0_11, %c0_12, %c0_13] : memref<2x16x384xf32, #tpu.memory_space<vmem>>, vector<2x16x384xf32>
    %9 = vector.shape_cast %8 : vector<2x16x384xf32> to vector<32x384xf32>
    %10 = arith.truncf %9 : vector<32x384xf32> to vector<32x384xbf16>
    %c0_14 = arith.constant 0 : index
    %c0_15 = arith.constant 0 : index
    %11 = vector.load %arg2[%c0_14, %c0_15] : memref<384x128xbf16, #tpu.memory_space<vmem>>, vector<384x128xbf16>
    %cst_16 = arith.constant dense<0.000000e+00> : vector<32x128xf32>
    %12 = tpu.matmul %10, %11, %cst_16 {dimension_numbers = #tpu.dot_dimension_numbers<[1], [0], [0], [1], [0, 0, 1, 1], [], []>} : vector<32x384xbf16>, vector<384x128xbf16>, vector<32x128xf32> -> vector<32x128xf32>
    %cst_17 = arith.constant dense<0.000000e+00> : vector<128xf32>
    %13 = vector.multi_reduction <add>, %12, %cst_17 [0] : vector<32x128xf32> to vector<128xf32>
    %14 = vector.shape_cast %13 : vector<128xf32> to vector<1x128xf32>
    %15 = arith.mulf %12, %12 : vector<32x128xf32>
    %cst_18 = arith.constant dense<0.000000e+00> : vector<128xf32>
    %16 = vector.multi_reduction <add>, %15, %cst_18 [0] : vector<32x128xf32> to vector<128xf32>
    %17 = vector.shape_cast %16 : vector<128xf32> to vector<1x128xf32>
    %c0_19 = arith.constant 0 : index
    %c0_20 = arith.constant 0 : index
    %18 = vector.load %arg3[%c0_19, %c0_20] : memref<128x128xf32, #tpu.memory_space<vmem>>, vector<128x128xf32>
    %cst_21 = arith.constant dense<0.000000e+00> : vector<1x128xf32>
    %19 = tpu.matmul %14, %18, %cst_21 {dimension_numbers = #tpu.dot_dimension_numbers<[1], [0], [0], [1], [0, 0, 1, 1], [], []>} : vector<1x128xf32>, vector<128x128xf32>, vector<1x128xf32> -> vector<1x128xf32>
    %c0_22 = arith.constant 0 : index
    %c0_23 = arith.constant 0 : index
    %20 = vector.load %arg3[%c0_22, %c0_23] : memref<128x128xf32, #tpu.memory_space<vmem>>, vector<128x128xf32>
    %cst_24 = arith.constant dense<0.000000e+00> : vector<1x128xf32>
    %21 = tpu.matmul %17, %20, %cst_24 {dimension_numbers = #tpu.dot_dimension_numbers<[1], [0], [0], [1], [0, 0, 1, 1], [], []>} : vector<1x128xf32>, vector<128x128xf32>, vector<1x128xf32> -> vector<1x128xf32>
    %cst_25 = arith.constant 0.001953125 : f32
    %22 = vector.broadcast %cst_25 : f32 to vector<1x128xf32>
    %23 = arith.mulf %19, %22 : vector<1x128xf32>
    %cst_26 = arith.constant 0.001953125 : f32
    %24 = vector.broadcast %cst_26 : f32 to vector<1x128xf32>
    %25 = arith.mulf %21, %24 : vector<1x128xf32>
    %26 = arith.mulf %23, %23 : vector<1x128xf32>
    %27 = arith.subf %25, %26 : vector<1x128xf32>
    %cst_27 = arith.constant 9.99999974E-6 : f32
    %28 = vector.broadcast %cst_27 : f32 to vector<1x128xf32>
    %29 = arith.addf %27, %28 : vector<1x128xf32>
    %30 = math.rsqrt %29 : vector<1x128xf32>
    %c0_28 = arith.constant 0 : index
    %c0_29 = arith.constant 0 : index
    %31 = vector.load %arg4[%c0_28, %c0_29] : memref<1x128xf32, #tpu.memory_space<vmem>>, vector<1x128xf32>
    %32 = arith.mulf %31, %30 : vector<1x128xf32>
    %c0_30 = arith.constant 0 : index
    %c0_31 = arith.constant 0 : index
    %33 = vector.load %arg5[%c0_30, %c0_31] : memref<1x128xf32, #tpu.memory_space<vmem>>, vector<1x128xf32>
    %34 = arith.mulf %23, %32 : vector<1x128xf32>
    %35 = arith.subf %33, %34 : vector<1x128xf32>
    %36 = vector.broadcast %32 : vector<1x128xf32> to vector<32x128xf32>
    %37 = arith.mulf %12, %36 : vector<32x128xf32>
    %38 = vector.broadcast %35 : vector<1x128xf32> to vector<32x128xf32>
    %39 = arith.addf %37, %38 : vector<32x128xf32>
    %cst_32 = arith.constant 0.000000e+00 : f32
    %40 = vector.broadcast %cst_32 : f32 to vector<32x128xf32>
    %41 = arith.maximumf %39, %40 : vector<32x128xf32>
    %42 = vector.shape_cast %0 : vector<2x16x128xf32> to vector<32x128xf32>
    %43 = arith.addf %41, %42 : vector<32x128xf32>
    %44 = vector.shape_cast %43 : vector<32x128xf32> to vector<2x16x128xf32>
    %c0_33 = arith.constant 0 : index
    %c0_34 = arith.constant 0 : index
    %c0_35 = arith.constant 0 : index
    %45 = vector.load %arg6[%c0_33, %c0_34, %c0_35] : memref<2x16x128xf32, #tpu.memory_space<vmem>>, vector<2x16x128xf32>
    tpu.vector_store %arg6[%c0_33, %c0_34, %c0_35], %44 {strides = array<i32>} : memref<2x16x128xf32, #tpu.memory_space<vmem>>, vector<2x16x128xf32>,
    return
  }
  func.func @transform_0(%arg0: i32) -> (i32, i32, i32) {
    %c0_i32 = arith.constant 0 : i32
    %c0_i32_0 = arith.constant 0 : i32
    %c0_i32_1 = arith.constant 0 : i32
    %c0_i32_2 = arith.constant 0 : i32
    return %c0_i32, %c0_i32_0, %c0_i32_1 : i32, i32, i32
  }
  func.func @transform_1(%arg0: i32) -> (i32, i32) {
    %c0_i32 = arith.constant 0 : i32
    %c0_i32_0 = arith.constant 0 : i32
    %c0_i32_1 = arith.constant 0 : i32
    return %c0_i32, %c0_i32_0 : i32, i32
  }
  func.func @transform_2(%arg0: i32) -> (i32, i32) {
    %c0_i32 = arith.constant 0 : i32
    %c0_i32_0 = arith.constant 0 : i32
    %c0_i32_1 = arith.constant 0 : i32
    return %c0_i32, %c0_i32_0 : i32, i32
  }
  func.func @transform_3(%arg0: i32) -> (i32, i32) {
    %c0_i32 = arith.constant 0 : i32
    %c0_i32_0 = arith.constant 0 : i32
    %c0_i32_1 = arith.constant 0 : i32
    return %c0_i32, %c0_i32_0 : i32, i32
  }
  func.func @transform_4(%arg0: i32) -> (i32, i32) {
    %c0_i32 = arith.constant 0 : i32
    %c0_i32_0 = arith.constant 0 : i32
    %c0_i32_1 = arith.constant 0 : i32
    return %c0_i32, %c0_i32_0 : i32, i32
  }
  func.func @transform_5(%arg0: i32) -> (i32, i32, i32) {
    %c0_i32 = arith.constant 0 : i32
    %c0_i32_0 = arith.constant 0 : i32
    %c0_i32_1 = arith.constant 0 : i32
    %c0_i32_2 = arith.constant 0 : i32
    return %c0_i32, %c0_i32_0, %c0_i32_1 : i32, i32, i32
  }
}

</mosaic_0001>

<bundles_post_ra>
// kernel: tile.13
= control target key start
LH: loop header
LB: loop body
LE: loop exit
PB: predicated region body
PF: predicated region fallthrough
CT: control target
= control target key end

     0   :  { %s28_s0 = inlined_call_operand.vmem [shape: f32[8], index: 0, kind: input, shape index: {}]   ;;  %s29_s1 = inlined_call_operand.vmem [shape: f32[16,8], index: 1, kind: output, shape index: {}]  }
   0x1   :  { %v4_v0 = vld [vmem:[%s28_s0] ss:$0 sm:$0xff] }
   0x2   :  { %5 = vst [vmem:[%s29_s1] sm:$0xff] %v4_v0  ;;  %8 = vst [vmem:[%s29_s1 + $0x8] sm:$0xff] %v4_v0 }

// kernel: tile.14
= control target key start
LH: loop header
LB: loop body
LE: loop exit
PB: predicated region body
PF: predicated region fallthrough
CT: control target
= control target key end

     0   :  { %s131_s10 = smov 120   ;;  %s132_s11 = smov 104   ;;  %vm3_vm0 = vcmask 64512   ;;  %vm9_vm1 = vcmask 1048512   ;;  %vm15_vm2 = vcmask 982912   ;;  %vm21_vm3 = vcmask 917312   ;;  %s207_s0 = inlined_call_operand.vmem [shape: f32[16,8], index: 0, kind: input, shape index: {}]   ;;  %s208_s1 = inlined_call_operand.vmem [shape: f32[1,128], index: 1, kind: output, shape index: {}]  }
   0x1   :  { %v101_v0 = vld [vmem:[%s207_s0 + $0xf] sm:$0x1]   ;;  %v103_v1 = vld [vmem:[%s207_s0 + $0xd] sm:$0x1]   ;;  %v102_v2 = vld [vmem:[%s207_s0 + $0xe] sm:$0x1]  }
   0x2   :  { %7 = vrot.lane.b32.xlu0 %v101_v0, %s131_s10  ;;  %19 = vrot.lane.b32.xlu1 %v103_v1, %s132_s11  ;;  %v104_v3 = vld [vmem:[%s207_s0 + $0xc] sm:$0x1]   ;;  %s133_s16 = smov 112   ;;  %s134_s17 = smov 96   ;;  %v105_v4 = vld [vmem:[%s207_s0 + $0xb] sm:$0x1]  }
   0x3   :  { %v106_v5 = vld [vmem:[%s207_s0 + $0xa] sm:$0x1]   ;;  %v2_v6 = vld [vmem:[%s207_s0] sm:$0x1]   ;;  %s135_s24 = smov 88   ;;  %s136_s25 = smov 80  }
   0x4   :  { %4 = vst.msk [vmem:[#allocation0] sm:$0x1] %vm3_vm0, %v2_v6   ;;  %v107_v7 = vld [vmem:[%s207_s0 + $0x9] sm:$0x1]   ;;  %v108_v8 = vld [vmem:[%s207_s0 + $0x8] sm:$0x1]  }
   0x5   :  { %s137_s30 = smov 72   ;;  %s138_s2 = smov 64   ;;  %v109_v9 = vld [vmem:[%s207_s0 + $0x7] sm:$0x1]   ;;  %v110_v10 = vld [vmem:[%s207_s0 + $0x6] sm:$0x1]  }
   0x6   :  { %13 = vrot.lane.b32.xlu0 %v102_v2, %s133_s16  ;;  %25 = vrot.lane.b32.xlu1 %v104_v3, %s134_s17  ;;  %s139_s7 = smov 56   ;;  %s140_s8 = smov 48   ;;  %v111_v11 = vld [vmem:[%s207_s0 + $0x5] sm:$0x1]   ;;  %v112_v12 = vld [vmem:[%s207_s0 + $0x4] sm:$0x1]  }
   0x7   :  { %s141_s13 = smov 40   ;;  %s142_s14 = smov 32   ;;  %v113_v13 = vld [vmem:[%s207_s0 + $0x3] sm:$0x1]   ;;  %v114_v14 = vld [vmem:[%s207_s0 + $0x2] sm:$0x1]  }
   0x8   :  { %s143_s19 = smov 24   ;;  %s144_s20 = smov 16   ;;  %v115_v15 = vld [vmem:[%s207_s0 + $0x1] sm:$0x1]   ;;  %vm27_vm4 = vcmask 851712   ;;  %vm33_vm5 = vcmask 786112  }
   0x9   :  { %s145_s0 = smov 8   ;;  %vm39_vm6 = vcmask 720512   ;;  %vm45_vm7 = vcmask 654912   ;;  %vm51_vm8 = vcmask 589312   ;;  %vm57_vm9 = vcmask 523712  }
   0xa   :  { %31 = vrot.lane.b32.xlu0 %v105_v4, %s135_s24  ;;  %37 = vrot.lane.b32.xlu1 %v106_v5, %s136_s25  ;;  %vm63_vm10 = vcmask 458112   ;;  %vm69_vm11 = vcmask 392512   ;;  %vm75_vm12 = vcmask 326912   ;;  %vm81_vm13 = vcmask 261312  }
   0xb   :  { %vm87_vm14 = vcmask 195712   ;;  %vm93_vm15 = vcmask 130112  }
   0xe   :  { %43 = vrot.lane.b32.xlu0 %v107_v7, %s137_s30  ;;  %49 = vrot.lane.b32.xlu1 %v108_v8, %s138_s2 }
  0x12   :  { %55 = vrot.lane.b32.xlu0 %v109_v9, %s139_s7  ;;  %61 = vrot.lane.b32.xlu1 %v110_v10, %s140_s8 }
  0x16   :  { %67 = vrot.lane.b32.xlu0 %v111_v11, %s141_s13  ;;  %73 = vrot.lane.b32.xlu1 %v112_v12, %s142_s14 }
  0x1a   :  { %79 = vrot.lane.b32.xlu0 %v113_v13, %s143_s19  ;;  %85 = vrot.lane.b32.xlu1 %v114_v14, %s144_s20 }
  0x1e   :  { %91 = vrot.lane.b32.xlu0 %v115_v15, %s145_s0 }
  0x74   :  { %v8_v16 = vpop.permute.xlu0 %7   ;;  %v20_v17 = vpop.permute.xlu1 %19  }
  0x75   :  { %10 = vst.msk [vmem:[#allocation0] sm:$0x1] %vm9_vm1, %v8_v16  }
  0x78   :  { %v14_v18 = vpop.permute.xlu0 %13   ;;  %v26_v19 = vpop.permute.xlu1 %25  }
  0x79   :  { %16 = vst.msk [vmem:[#allocation0] sm:$0x1] %vm15_vm2, %v14_v18  }
  0x7a   :  { %22 = vst.msk [vmem:[#allocation0] sm:$0x1] %vm21_vm3, %v20_v17  }
  0x7b   :  { %28 = vst.msk [vmem:[#allocation0] sm:$0x1] %vm27_vm4, %v26_v19  }
  0x7c   :  { %v32_v20 = vpop.permute.xlu0 %31   ;;  %v38_v21 = vpop.permute.xlu1 %37  }
  0x7d   :  { %34 = vst.msk [vmem:[#allocation0] sm:$0x1] %vm33_vm5, %v32_v20  }
  0x7e   :  { %40 = vst.msk [vmem:[#allocation0] sm:$0x1] %vm39_vm6, %v38_v21  }
  0x80   :  { %v44_v22 = vpop.permute.xlu0 %43   ;;  %v50_v23 = vpop.permute.xlu1 %49  }
  0x81   :  { %46 = vst.msk [vmem:[#allocation0] sm:$0x1] %vm45_vm7, %v44_v22  }
  0x82   :  { %52 = vst.msk [vmem:[#allocation0] sm:$0x1] %vm51_vm8, %v50_v23  }
  0x84   :  { %v56_v24 = vpop.permute.xlu0 %55   ;;  %v62_v25 = vpop.permute.xlu1 %61  }
  0x85   :  { %58 = vst.msk [vmem:[#allocation0] sm:$0x1] %vm57_vm9, %v56_v24  }
  0x86   :  { %64 = vst.msk [vmem:[#allocation0] sm:$0x1] %vm63_vm10, %v62_v25  }
  0x88   :  { %v68_v26 = vpop.permute.xlu0 %67   ;;  %v74_v27 = vpop.permute.xlu1 %73  }
  0x89   :  { %70 = vst.msk [vmem:[#allocation0] sm:$0x1] %vm69_vm11, %v68_v26  }
  0x8a   :  { %76 = vst.msk [vmem:[#allocation0] sm:$0x1] %vm75_vm12, %v74_v27  }
  0x8c   :  { %v80_v28 = vpop.permute.xlu0 %79   ;;  %v86_v29 = vpop.permute.xlu1 %85  }
  0x8d   :  { %82 = vst.msk [vmem:[#allocation0] sm:$0x1] %vm81_vm13, %v80_v28  }
  0x8e   :  { %88 = vst.msk [vmem:[#allocation0] sm:$0x1] %vm87_vm14, %v86_v29  }
  0x90   :  { %v92_v30 = vpop.permute.xlu0 %91  }
  0x91   :  { %94 = vst.msk [vmem:[#allocation0] sm:$0x1] %vm93_vm15, %v92_v30  }
  0x98   :  { %v98_v31 = vld [vmem:[#allocation0] sm:$0x1] }
  0x99   :  { %100 = vst [vmem:[%s208_s1] sm:$0x1] %v98_v31 }

// kernel: resblock_pallas.1
= control target key start
LH: loop header
LB: loop body
LE: loop exit
PB: predicated region body
PF: predicated region fallthrough
CT: control target
= control target key end

     0   :  { %v871_v1 = vmov 0.0   ;;  %vm41_vm0 = vcmask 1040384   ;;  %vm60_vm1 = vcmask 1046528   ;;  %v872_v42 = vmov 0.0|0.0   ;;  %s1104_s1 = inlined_call_operand.vmem [shape: bf16[384,128], index: 1, kind: input, shape index: {}]   ;;  %s1105_s0 = inlined_call_operand.vmem [shape: f32[2,16,128], index: 0, kind: input, shape index: {}]   ;;  %s1106_s2 = inlined_call_operand.vmem [shape: f32[128,128], index: 2, kind: input, shape index: {}]   ;;  %s1107_s3 = inlined_call_operand.vmem [shape: f32[1,128], index: 3, kind: input, shape index: {}]   ;;  %s1108_s4 = inlined_call_operand.vmem [shape: f32[1,128], index: 4, kind: input, shape index: {}]   ;;  %s1109_s5 = inlined_call_operand.vmem [shape: f32[2,16,128], index: 5, kind: output, shape index: {}]  }
   0x1   :  { %v845_v0 = vld [vmem:[%s1104_s1 + $0x40] sm:$0xff]   ;;  %25 = vst [vmem:[#allocation2] sm:$0xff] %v871_v1  ;;  %30 = vst [vmem:[#allocation2 + $0x28] sm:$0xff] %v871_v1  ;;  %v848_v4 = vld [vmem:[%s1104_s1 + $0x48] sm:$0xff]   ;;  %vm873_vm2 = vmmov 0  }
   0x2   :  { %31 = vst [vmem:[#allocation2 + $0x30] sm:$0xff] %v871_v1  ;;  %36 = vst [vmem:[#allocation2 + $0x58] sm:$0xff] %v871_v1  ;;  %v846_v2 = vld [vmem:[%s1104_s1] sm:$0xff]   ;;  %632 = vmatprep.subr.bf16.mxu0 %v845_v0  ;;  %v849_v5 = vld [vmem:[%s1104_s1 + $0x8] sm:$0xff]  }
   0x3   :  { %v847_v3 = vld [vmem:[%s1104_s1 + $0x80] sm:$0xff]   ;;  %633 = vmatpush3.bf16.msra.mxu0 %v846_v2  ;;  %v850_v6 = vld [vmem:[%s1104_s1 + $0x88] sm:$0xff]   ;;  %v851_v7 = vld [vmem:[%s1104_s1 + $0x50] sm:$0xff]  }
   0x4   :  { %704 = vmatprep.subr.bf16.mxu1 %v847_v3  ;;  %634 = vmatprep.subr.bf16.mxu0 %v848_v4  ;;  %v852_v8 = vld [vmem:[%s1104_s1 + $0x10] sm:$0xff]   ;;  %v854_v10 = vld [vmem:[%s1104_s1 + $0x58] sm:$0xff]   ;;  %v857_v13 = vld [vmem:[%s1104_s1 + $0x60] sm:$0xff]  }
   0x5   :  { %705 = vmatpush3.bf16.msra.mxu1 %v847_v3  ;;  %v853_v9 = vld [vmem:[%s1104_s1 + $0x90] sm:$0xff]   ;;  %v855_v11 = vld [vmem:[%s1104_s1 + $0x18] sm:$0xff]   ;;  %v859_v14 = vld [vmem:[%s1104_s1 + $0xa0] sm:$0xff]  }
   0x6   :  { %706 = vmatprep.subr.bf16.mxu1 %v850_v6  ;;  %v856_v12 = vld [vmem:[%s1104_s1 + $0x98] sm:$0xff]   ;;  %v858_v15 = vld [vmem:[%s1104_s1 + $0x20] sm:$0xff]   ;;  %v860_v16 = vld [vmem:[%s1104_s1 + $0x68] sm:$0xff]  }
   0x7   :  { %635 = vmatpush3.bf16.msra.mxu0 %v849_v5  ;;  %v862_v17 = vld [vmem:[%s1104_s1 + $0xa8] sm:$0xff]   ;;  %v863_v19 = vld [vmem:[%s1104_s1 + $0x70] sm:$0xff]   ;;  %v866_v22 = vld [vmem:[%s1104_s1 + $0x78] sm:$0xff]  }
   0x8   :  { %636 = vmatprep.subr.bf16.mxu0 %v851_v7  ;;  %v861_v18 = vld [vmem:[%s1104_s1 + $0x28] sm:$0xff]   ;;  %v864_v20 = vld [vmem:[%s1104_s1 + $0x30] sm:$0xff]   ;;  %v977_v23 = vld [vmem:[%s1105_s0] sm:$0xff] }
   0x9   :  { %707 = vmatpush3.bf16.msra.mxu1 %v850_v6  ;;  %v865_v21 = vld [vmem:[%s1104_s1 + $0xb0] sm:$0xff]   ;;  %v982_v24 = vld [vmem:[%s1105_s0 + $0x8] sm:$0xff]  ;;  %v42_v28 = vrot.slane %v977_v23, 7  ;;  %v61_v29 = vrot.slane %v977_v23, 1  ;;  %v997_v30 = vld [vmem:[%s1105_s0 + $0x18] sm:$0xff] }
   0xa   :  { %708 = vmatprep.subr.bf16.mxu1 %v853_v9  ;;  %v987_v25 = vld [vmem:[%s1105_s0 + $0x10] sm:$0xff]  ;;  %v43_v26 = vrot.slane %v982_v24, 7  ;;  %v88_v27 = vpack.c.bf16 %v982_v24, %v977_v23  ;;  %v868_v31 = vld [vmem:[%s1104_s1 + $0xb8] sm:$0xff]   ;;  %v62_v32 = vrot.slane %v982_v24, 1  ;;  %v65_v34 = vrot.slane %v997_v30, 1  ;;  %v405_v43 = vld [vmem:[%s1106_s2] sm:$0xff] }
   0xb   :  { %637 = vmatpush3.bf16.msra.mxu0 %v852_v8  ;;  %v64_v33 = vrot.slane %v987_v25, 1  ;;  %v867_v35 = vld [vmem:[%s1104_s1 + $0x38] sm:$0xff]   ;;  %52 = vst [vmem:[#allocation2] sm:$0xfe] %v42_v28  ;;  %v45_v37 = vrot.slane %v987_v25, 7  ;;  %v46_v38 = vrot.slane %v997_v30, 7  ;;  %v91_v46 = vpack.c.bf16 %v997_v30, %v987_v25 }
   0xc   :  { %638 = vmatprep.subr.bf16.mxu0 %v854_v10  ;;  %317 = vmatprep.mubr.bf16.mxu0 %v88_v27  ;;  %v44_v36 = vsel %vm41_vm0, %v42_v28, %v43_v26  ;;  %v63_v39 = vsel %vm60_vm1, %v61_v29, %v62_v32  ;;  %72 = vst [vmem:[#allocation2 + $0x28] sm:$0x7f] %v62_v32  ;;  %74 = vst [vmem:[#allocation2 + $0x58] sm:$0x7f] %v65_v34  ;;  %v406_v44 = vld [vmem:[%s1106_s2 + $0x8] sm:$0xff]  ;;  %v407_v55 = vld [vmem:[%s1106_s2 + $0x10] sm:$0xff] }
   0xd   :  { %709 = vmatpush3.bf16.msra.mxu1 %v853_v9  ;;  %v66_v40 = vsel %vm60_vm1, %v64_v33, %v65_v34  ;;  %v47_v41 = vsel %vm41_vm0, %v45_v37, %v46_v38  ;;  %54 = vst [vmem:[#allocation2 + $0x30] sm:$0xfe] %v45_v37  ;;  %v795_v50 = vpack.c.bf16 %v406_v44, %v405_v43  ;;  %v408_v56 = vld [vmem:[%s1106_s2 + $0x18] sm:$0xff]  ;;  %v409_v58 = vld [vmem:[%s1106_s2 + $0x20] sm:$0xff]  ;;  %v410_v59 = vld [vmem:[%s1106_s2 + $0x28] sm:$0xff] }
   0xe   :  { %710 = vmatprep.subr.bf16.mxu1 %v856_v12  ;;  %v798_v57 = vpack.c.bf16 %v408_v56, %v407_v55  ;;  %v801_v60 = vpack.c.bf16 %v410_v59, %v409_v58  ;;  %v411_v61 = vld [vmem:[%s1106_s2 + $0x30] sm:$0xff]  ;;  %v412_v62 = vld [vmem:[%s1106_s2 + $0x38] sm:$0xff]  ;;  %v413_v0 = vld [vmem:[%s1106_s2 + $0x40] sm:$0xff] }
   0xf   :  { %639 = vmatpush3.bf16.msra.mxu0 %v855_v11  ;;  %v804_v63 = vpack.c.bf16 %v412_v62, %v411_v61  ;;  %v414_v2 = vld [vmem:[%s1106_s2 + $0x48] sm:$0xff]  ;;  %v415_v4 = vld [vmem:[%s1106_s2 + $0x50] sm:$0xff]  ;;  %v416_v5 = vld [vmem:[%s1106_s2 + $0x58] sm:$0xff] }
  0x10   :  { %640 = vmatprep.subr.bf16.mxu0 %v857_v13  ;;  %v807_v3 = vpack.c.bf16 %v414_v2, %v413_v0  ;;  %v810_v6 = vpack.c.bf16 %v416_v5, %v415_v4  ;;  %v417_v7 = vld [vmem:[%s1106_s2 + $0x60] sm:$0xff]  ;;  %v418_v8 = vld [vmem:[%s1106_s2 + $0x68] sm:$0xff]  ;;  %v419_v10 = vld [vmem:[%s1106_s2 + $0x70] sm:$0xff]  ;;  %v573_v4 = vlaneseq }
  0x11   :  { %711 = vmatpush3.bf16.msra.mxu1 %v856_v12  ;;  %v813_v9 = vpack.c.bf16 %v418_v8, %v417_v7  ;;  %v420_v11 = vld [vmem:[%s1106_s2 + $0x78] sm:$0xff] }
  0x12   :  { %712 = vmatprep.subr.bf16.mxu1 %v859_v14  ;;  %v75_v45 = vld [vmem:[#allocation2] sm:$0xff]  ;;  %v816_v12 = vpack.c.bf16 %v420_v11, %v419_v10  ;;  %v574_v5 = vshrl.u32 %v573_v4, 7 }
  0x13   :  { %641 = vmatpush3.bf16.msra.mxu0 %v858_v15  ;;  %v87_v47 = vpack.c.bf16 %v44_v36, %v75_v45  ;;  %v80_v48 = vld [vmem:[#allocation2 + $0x28] sm:$0xff]  ;;  %v86_v49 = vld [vmem:[#allocation2 + $0x58] sm:$0xff]  ;;  %v569_v10 = vld [vmem:[%s1108_s4] sm:$0x1] }
  0x14   :  { %642 = vmatprep.subr.bf16.mxu0 %v860_v16  ;;  %v89_v51 = vpack.c.bf16 %v80_v48, %v63_v39  ;;  %v92_v52 = vpack.c.bf16 %v86_v49, %v66_v40  ;;  %v81_v53 = vld [vmem:[#allocation2 + $0x30] sm:$0xff]  ;;  %v575_v7 = vsub.s32 0, %v574_v5 }
  0x15   :  { %713 = vmatpush3.bf16.msra.mxu1 %v859_v14  ;;  %v90_v54 = vpack.c.bf16 %v47_v41, %v81_v53 }
  0x16   :  { %714 = vmatprep.subr.bf16.mxu1 %v862_v17  ;;  %720 = vmatprep.mubr.bf16.mxu1 %v89_v51 }
  0x17   :  { %643 = vmatpush3.bf16.msra.mxu0 %v861_v18 }
  0x18   :  { %644 = vmatprep.subr.bf16.mxu0 %v863_v19 }
  0x19   :  { %715 = vmatpush3.bf16.msra.mxu1 %v862_v17 }
  0x1a   :  { %716 = vmatprep.subr.bf16.mxu1 %v865_v21 }
  0x1b   :  { %645 = vmatpush3.bf16.msra.mxu0 %v864_v20 }
  0x1c   :  { %646 = vmatprep.subr.bf16.mxu0 %v866_v22 }
  0x1d   :  { %717 = vmatpush3.bf16.msra.mxu1 %v865_v21 }
  0x1e   :  { %718 = vmatprep.subr.bf16.mxu1 %v868_v31 }
  0x1f   :  { %647 = vmatpush3.bf16.msra.mxu0 %v867_v35 }
  0x20   :  { %794 = vmatprep.subr.bf16.mxu0 %v872_v42 }
  0x21   :  { %719 = vmatpush3.bf16.msra.mxu1 %v868_v31 }
  0x22   :  { %818 = vmatprep.subr.bf16.mxu1 %v872_v42  ;;  %318 = vmatmul.mubr.bf16.vlgmr.msra.gmra.mrb[0].mxu0 %v87_v47 }
  0x23   :  { %325 = vmatprep.mubr.bf16.mxu0 %v91_v46  ;;  %796 = vmatpush3.bf16.msra.mxu0 %v795_v50 }
  0x24   :  { %721 = vmatmul.mubr.bf16.vlgmr.msra.gmra.mrb[0].mxu1 %v92_v52  ;;  %797 = vmatprep.subr.bf16.mxu0 %v872_v42 }
  0x25   :  { %820 = vmatpush3.bf16.msra.mxu1 %v795_v50  ;;  %791 = vmatprep.mubr.msk.f32.mxu1 %vm873_vm2, %v871_v1 }
  0x26   :  { %821 = vmatprep.subr.bf16.mxu1 %v872_v42 }
  0x27   :  { %799 = vmatpush3.bf16.msra.mxu0 %v798_v57 }
  0x28   :  { %800 = vmatprep.subr.bf16.mxu0 %v872_v42 }
  0x29   :  { %823 = vmatpush3.bf16.msra.mxu1 %v798_v57 }
  0x2a   :  { %326 = vmatmul.mubr.bf16.gmra.mrb[4].mxu0 %v90_v54  ;;  %824 = vmatprep.subr.bf16.mxu1 %v872_v42 }
  0x2b   :  { %802 = vmatpush3.bf16.msra.mxu0 %v801_v60  ;;  %756 = vmatprep.mubr.msk.f32.mxu0 %vm873_vm2, %v871_v1 }
  0x2c   :  { %803 = vmatprep.subr.bf16.mxu0 %v872_v42 }
  0x2d   :  { %826 = vmatpush3.bf16.msra.mxu1 %v801_v60 }
  0x2e   :  { %827 = vmatprep.subr.bf16.mxu1 %v872_v42 }
  0x2f   :  { %805 = vmatpush3.bf16.msra.mxu0 %v804_v63 }
  0x30   :  { %806 = vmatprep.subr.bf16.mxu0 %v872_v42 }
  0x31   :  { %829 = vmatpush3.bf16.msra.mxu1 %v804_v63 }
  0x32   :  { %830 = vmatprep.subr.bf16.mxu1 %v872_v42 }
  0x33   :  { %808 = vmatpush3.bf16.msra.mxu0 %v807_v3 }
  0x34   :  { %809 = vmatprep.subr.bf16.mxu0 %v872_v42 }
  0x35   :  { %832 = vmatpush3.bf16.msra.mxu1 %v807_v3 }
  0x36   :  { %833 = vmatprep.subr.bf16.mxu1 %v872_v42 }
  0x37   :  { %811 = vmatpush3.bf16.msra.mxu0 %v810_v6 }
  0x38   :  { %812 = vmatprep.subr.bf16.mxu0 %v872_v42 }
  0x39   :  { %835 = vmatpush3.bf16.msra.mxu1 %v810_v6  ;;  %v567_v6 = vld [vmem:[%s1107_s3] sm:$0x1] }
  0x3a   :  { %836 = vmatprep.subr.bf16.mxu1 %v872_v42 }
  0x3b   :  { %814 = vmatpush3.bf16.msra.mxu0 %v813_v9 }
  0x3c   :  { %815 = vmatprep.subr.bf16.mxu0 %v872_v42 }
  0x3d   :  { %838 = vmatpush3.bf16.msra.mxu1 %v813_v9 }
  0x3e   :  { %839 = vmatprep.subr.bf16.mxu1 %v872_v42 }
  0x3f   :  { %817 = vmatpush3.bf16.msra.mxu0 %v816_v12 }
  0x41   :  { %841 = vmatpush3.bf16.msra.mxu1 %v816_v12 }
  0xf5   :  { %v648_v13 = vpop.f32.mrb[0].mxu0 }
  0xf6   :  { %v649_v14 = vpop.f32.mrb[1].mxu0 }
  0xf7   :  { %v650_v15 = vadd.f32 %v649_v14, %v648_v13  ;;  %v651_v16 = vpop.f32.mrb[2].mxu0  ;;  %v722_v17 = vpop.f32.mrb[0].mxu1 }
  0xf8   :  { %v652_v18 = vpop.f32.mrb[3].mxu0  ;;  %v368_v19 = vpop.f32.mrb[1].mxu1 }
  0xf9   :  { %v653_v20 = vadd.f32 %v652_v18, %v651_v16  ;;  %v369_v21 = vadd.f32 %v650_v15, %v368_v19  ;;  %v723_v22 = vpop.f32.mrb[2].mxu1 }
  0xfa   :  { %v371_v26 = vpop.f32.mrb[3].mxu1 }
  0xfb   :  { %v372_v27 = vadd.f32 %v653_v20, %v371_v26  ;;  %v392_v35 = vmul.f32 %v369_v21, %v369_v21 }
  0xfd   :  { %v654_v28 = vpop.f32.mrb[4].mxu0  ;;  %v393_v31 = vmul.f32 %v372_v27, %v372_v27  ;;  %v383_v1 = vadd.f32 %v372_v27, %v369_v21 }
  0xfe   :  { %v655_v29 = vpop.f32.mrb[5].mxu0 }
  0xff   :  { %v656_v32 = vadd.f32 %v655_v29, %v654_v28  ;;  %v657_v33 = vpop.f32.mrb[6].mxu0  ;;  %v396_v38 = vadd.f32 %v393_v31, %v392_v35 }
 0x100   :  { %v658_v34 = vpop.f32.mrb[7].mxu0 }
 0x101   :  { %v377_v36 = vadd.f32 %v722_v17, %v656_v32  ;;  %v659_v37 = vadd.f32 %v658_v34, %v657_v33 }
 0x103   :  { %v384_v39 = vadd.f32 %v383_v1, %v377_v36  ;;  %v394_v40 = vmul.f32 %v377_v36, %v377_v36  ;;  %v380_v41 = vadd.f32 %v723_v22, %v659_v37 }
 0x105   :  { %v397_v42 = vadd.f32 %v396_v38, %v394_v40  ;;  %v385_v43 = vadd.f32 %v384_v39, %v380_v41  ;;  %v395_v44 = vmul.f32 %v380_v41, %v380_v41 }
 0x107   :  { %v386_v45 = vrot.slane %v385_v43, 4  ;;  %v398_v46 = vadd.f32 %v397_v42, %v395_v44 }
 0x109   :  { %v387_v47 = vadd.f32 %v386_v45, %v385_v43  ;;  %v399_v48 = vrot.slane %v398_v46, 4 }
 0x10b   :  { %v388_v49 = vrot.slane %v387_v47, 2  ;;  %v400_v50 = vadd.f32 %v399_v48, %v398_v46 }
 0x10d   :  { %v389_v51 = vadd.f32 %v388_v49, %v387_v47  ;;  %v401_v52 = vrot.slane %v400_v50, 2 }
 0x10f   :  { %v390_v53 = vrot.slane %v389_v51, 1  ;;  %v402_v54 = vadd.f32 %v401_v52, %v400_v50 }
 0x111   :  { %v391_v55 = vadd.f32 %v390_v53, %v389_v51  ;;  %v403_v56 = vrot.slane %v402_v54, 1 }
 0x113   :  { %757 = vmatmul.mubr.f32.vlgmr.msra.gmra.mrb[8].mxu0 %v391_v55  ;;  %v404_v57 = vadd.f32 %v403_v56, %v402_v54 }
 0x115   :  { %792 = vmatmul.mubr.f32.vlgmr.msra.gmra.mrb[4].mxu1 %v404_v57 }
 0x1e6   :  { %v487_v58 = vpop.f32.mrb[8].mxu0 }
 0x1e7   :  { %v561_v59 = vmul.f32 0.001953125, %v487_v58  ;;  %v758_v60 = vpop.f32.mrb[9].mxu0 }
 0x1e8   :  { %v557_v61 = vpop.f32.mrb[4].mxu1 }
 0x1e9   :  { %v563_v62 = vmul.f32 %v561_v59, %v561_v59  ;;  %v562_v63 = vmul.f32 0.001953125, %v557_v61  ;;  %v793_v0 = vpop.f32.mrb[5].mxu1 }
 0x1eb   :  { %v564_v2 = vsub.f32 %v562_v63, %v563_v62 }
 0x1ed   :  { %v565_v3 = vadd.f32 1e-05, %v564_v2 }
 0x1ef   :  { %869 = vrsqrt.f32 %v565_v3 }
 0x1f9   :  { %v870_v8 = vpop.eup %869 }
 0x1fa   :  { %v568_v9 = vmul.f32 %v870_v8, %v567_v6 }
 0x1fc   :  { %v570_v11 = vmul.f32 %v568_v9, %v561_v59  ;;  %v576_v12 = vrot.slane %v568_v9, %v575_v7 }
 0x1fe   :  { %v571_v13 = vsub.f32 %v569_v10, %v570_v11  ;;  %v578_v14 = vmul.f32 %v576_v12, %v369_v21  ;;  %v579_v15 = vmul.f32 %v576_v12, %v372_v27  ;;  %v580_v16 = vmul.f32 %v576_v12, %v377_v36 }
 0x1ff   :  { %v581_v17 = vmul.f32 %v576_v12, %v380_v41 }
 0x200   :  { %v586_v18 = vrot.slane %v571_v13, %v575_v7 }
 0x202   :  { %v588_v19 = vadd.f32 %v586_v18, %v578_v14  ;;  %v589_v20 = vadd.f32 %v586_v18, %v579_v15  ;;  %v590_v22 = vadd.f32 %v586_v18, %v580_v16  ;;  %v591_v26 = vadd.f32 %v586_v18, %v581_v17 }
 0x204   :  { %v592_v28 = vmax.f32 %v588_v19, 0.0  ;;  %v593_v29 = vmax.f32 %v589_v20, 0.0  ;;  %v594_v31 = vmax.f32 %v590_v22, 0.0  ;;  %v595_v32 = vmax.f32 %v591_v26, 0.0 }
 0x206   :  { %v596_v33 = vadd.f32 %v592_v28, %v977_v23  ;;  %v597_v34 = vadd.f32 %v593_v29, %v982_v24  ;;  %v598_v35 = vadd.f32 %v594_v31, %v987_v25  ;;  %v599_v21 = vadd.f32 %v595_v32, %v997_v30 }
 0x208   :  { %600 = vst [vmem:[%s1109_s5] sm:$0xff] %v596_v33  ;;  %601 = vst [vmem:[%s1109_s5 + $0x8] sm:$0xff] %v597_v34 }
 0x209   :  { %602 = vst [vmem:[%s1109_s5 + $0x10] sm:$0xff] %v598_v35  ;;  %603 = vst [vmem:[%s1109_s5 + $0x18] sm:$0xff] %v599_v21 }

</bundles_post_ra>
